<compile_context>
chip_gen: v6e
topology: v6e:2x2x1
jax: 0.10.0
libtpu: 0.0.40
codegen_flags: <defaults>
</compile_context>

<pallas_src>
import jax
import jax.numpy as jnp
from jax.experimental import pallas as pl
from jax.experimental.pallas import tpu as pltpu


# ----------------------------------------------------------------------------
# Zero-copy path: aliased no-op kernel (default).
# ----------------------------------------------------------------------------

def _noop_kernel(x_ref, o_ref):
    # Output buffer aliases the input buffer (input_output_aliases={0: 0}):
    # nothing to move.  touch() adds the fake read/write dependency so the
    # aliased output is considered produced by this call.
    del x_ref
    pltpu.touch(o_ref)


def _aliased_noop(x):
    n, flat = x.shape
    return pl.pallas_call(
        _noop_kernel,
        out_shape=jax.ShapeDtypeStruct((n, flat), x.dtype),
        in_specs=[pl.BlockSpec(memory_space=pl.ANY)],
        out_specs=pl.BlockSpec(memory_space=pl.ANY),
        input_output_aliases={0: 0},
        compiler_params=pltpu.CompilerParams(has_side_effects=True),
        cost_estimate=pl.CostEstimate(flops=0, transcendentals=0,
                                      bytes_accessed=0),
    )(x)


# ----------------------------------------------------------------------------
# Optional materializing copy path (lane-dense flattened view).
# ----------------------------------------------------------------------------

def _copy_kernel(x_ref, o_ref):
    # Identity copy of the current (TR, TL) tile (pure data movement).
    o_ref[...] = x_ref[...]


def _floor_to(v, m):
    return (v // m) * m


def _largest_divisor_multiple_of(total, base, cap):
    """Largest d <= cap with d % base == 0 and total % d == 0; None if none."""
    best = None
    d = base
    while d <= cap:
        if total % d == 0:
            best = d
        d += base
    return best


def _choose_view_and_tiles(n, flat, itemsize, vmem_budget_bytes):
    """Pick a free 2-D view (R, L) of the (n, flat) array and tiles (TR, TL)."""
    total = n * flat
    # Sublane granularity per dtype (f32: 8, bf16: 16, int8/fp8: 32).
    sub = {4: 8, 2: 16, 1: 32}.get(itemsize, 8)
    # Input + output, each double-buffered -> 4 VMEM buffers.
    per_buf = max(4096, vmem_budget_bytes // 4)

    if total % 128 == 0:
        # Lane-dense view: L is a 128-multiple divisor of the element count so
        # every store is an unmasked, lane-dense vst and every block DMA is one
        # contiguous stream.
        lane_cap = min(4096, max(128, _floor_to(per_buf // (sub * itemsize), 128)))
        L = _largest_divisor_multiple_of(total, 128, lane_cap)
        R = total // L
        tl = L
        rows_fit = max(sub, _floor_to(per_buf // (L * itemsize), sub))
        if R >= 2 * sub:
            # Aim for >=2 row blocks so both v7x TensorCores get DMA work.
            cap = min(rows_fit, max(sub, _floor_to(R // 2, sub)))
        else:
            cap = rows_fit
        tr = _largest_divisor_multiple_of(R, sub, cap)
        if tr is None:
            tr = R if R <= rows_fit else rows_fit  # full extent, or masked tail
    else:
        # Rare fallback (total not 128-divisible): tile the original (n, flat)
        # view, always respecting the VMEM budget (review fix: no tn=flat blowup).
        R, L = n, flat
        if L * sub * itemsize <= per_buf:
            tl = L
        else:
            tl = max(128, _floor_to(per_buf // (sub * itemsize), 128))
        rows_fit = max(sub, _floor_to(per_buf // (tl * itemsize), sub))
        if R <= rows_fit:
            tr = R
        else:
            tr = _largest_divisor_multiple_of(R, sub, rows_fit) or rows_fit

    return R, L, tr, tl


def _lane_dense_copy(x, vmem_budget_bytes):
    n, flat = x.shape
    itemsize = jnp.dtype(x.dtype).itemsize
    R, L, tr, tl = _choose_view_and_tiles(n, flat, itemsize, vmem_budget_bytes)

    x2d = jnp.reshape(x, (R, L))  # free row-major metadata reshape

    params = {"dimension_semantics": ("parallel", "parallel")}
    if vmem_budget_bytes > (12 << 20):
        # Raised budgets need an explicit scoped-VMEM limit (v5e default 16 MiB);
        # cap with headroom well under v7x's 64 MiB physical VMEM.
        params["vmem_limit_bytes"] = int(min(vmem_budget_bytes + (4 << 20),
                                             48 << 20))

    copied = pl.pallas_call(
        _copy_kernel,
        out_shape=jax.ShapeDtypeStruct((R, L), x.dtype),
        grid=(pl.cdiv(R, tr), pl.cdiv(L, tl)),
        in_specs=[pl.BlockSpec((tr, tl), lambda i, j: (i, j))],
        out_specs=pl.BlockSpec((tr, tl), lambda i, j: (i, j)),
        compiler_params=pltpu.CompilerParams(**params),
        cost_estimate=pl.CostEstimate(flops=0, transcendentals=0,
                                      bytes_accessed=2 * n * flat * itemsize),
    )(x2d)
    return jnp.reshape(copied, (n, flat))


# ----------------------------------------------------------------------------
# Public wrapper.
# ----------------------------------------------------------------------------

def unflatten(x, channel, height, width, *, materialize=False,
              vmem_budget_bytes=8 << 20):
    """x: (N, channel*height*width) -> (N, channel, height, width).

    Default path is the zero-HBM-traffic aliased no-op kernel; set
    materialize=True to force an explicit (roofline-tiled) HBM copy.
    """
    n, flat = x.shape
    assert flat == channel * height * width, "input feature dim mismatch"

    if materialize:
        flat2d = _lane_dense_copy(x, vmem_budget_bytes)
    else:
        try:
            flat2d = _aliased_noop(x)
        except Exception:
            # Portability guard: if this jax/libtpu build rejects the aliased
            # no-op lowering, fall back to the roofline copy (still correct).
            flat2d = _lane_dense_copy(x, vmem_budget_bytes)

    # Free, row-major metadata reshape — identical ordering to torch .view().
    return jnp.reshape(flat2d, (n, channel, height, width))


if __name__ == "__main__":
    # Shapes implied by the module: batch=2, channel=4, 16x16 spatial.
    N, C, H, W = 2, 4, 16, 16
    key = jax.random.PRNGKey(0)
    x = jax.random.normal(key, (N, C * H * W), dtype=jnp.float32)
    ref = jnp.reshape(x, (N, C, H, W))

    # Primary (default) path: zero-copy aliased no-op kernel + free reshape.
    out = jax.block_until_ready(unflatten(x, C, H, W))
    assert out.shape == (N, C, H, W)
    assert out.dtype == x.dtype
    assert bool(jnp.array_equal(out, ref))

    # Materializing copy path, default budget (single lane-dense block).
    out_m = jax.block_until_ready(unflatten(x, C, H, W, materialize=True))
    assert bool(jnp.array_equal(out_m, ref))

    # Materializing path with a tiny VMEM budget: view (32, 512), tile (8, 512),
    # grid (4, 1) — exercises the multi-block, fully unmasked pipeline.
    N2, C2, H2, W2 = 16, 4, 16, 16
    x2 = jax.random.normal(jax.random.PRNGKey(0), (N2, C2 * H2 * W2),
                           dtype=jnp.float32)
    out2 = jax.block_until_ready(
        unflatten(x2, C2, H2, W2, materialize=True,
                  vmem_budget_bytes=64 * 1024))
    assert bool(jnp.array_equal(out2, jnp.reshape(x2, (N2, C2, H2, W2))))

    print("KERNEL_OK")
</pallas_src>

<mosaic_0001>
module attributes {stable_mosaic.version = 11 : i64} {
  func.func @_noop_kernel(%arg0: memref<2x1024xf32, #tpu.memory_space<any>>, %arg1: memref<2x1024xf32, #tpu.memory_space<any>>) attributes {dimension_semantics = [], scalar_prefetch = 0 : i64, scratch_operands = 0 : i64, tpu.core_type = #tpu.core_type<tc>} {
    return
  }
}

module attributes {stable_mosaic.version = 11 : i64} {
  func.func @_copy_kernel(%arg0: i32, %arg1: i32, %arg2: memref<1x2048xf32, #tpu.memory_space<vmem>>, %arg3: memref<1x2048xf32, #tpu.memory_space<vmem>>) attributes {dimension_semantics = [#tpu.dimension_semantics<parallel>, #tpu.dimension_semantics<parallel>], iteration_bounds = array<i64: 1, 1>, scalar_prefetch = 0 : i64, scratch_operands = 0 : i64, tpu.core_type = #tpu.core_type<tc>, window_params = [{transform_indices = @transform_0, window_bounds = array<i64: 1, 2048>}, {transform_indices = @transform_1, window_bounds = array<i64: 1, 2048>}]} {
    %c0 = arith.constant 0 : index
    %c0_0 = arith.constant 0 : index
    %0 = vector.load %arg2[%c0, %c0_0] : memref<1x2048xf32, #tpu.memory_space<vmem>>, vector<1x2048xf32>
    %c0_1 = arith.constant 0 : index
    %c0_2 = arith.constant 0 : index
    %1 = vector.load %arg3[%c0_1, %c0_2] : memref<1x2048xf32, #tpu.memory_space<vmem>>, vector<1x2048xf32>
    tpu.vector_store %arg3[%c0_1, %c0_2], %0 {strides = array<i32>} : memref<1x2048xf32, #tpu.memory_space<vmem>>, vector<1x2048xf32>,
    return
  }
  func.func @transform_0(%arg0: i32, %arg1: i32) -> (i32, i32) {
    %c0_i32 = arith.constant 0 : i32
    return %arg0, %arg1 : i32, i32
  }
  func.func @transform_1(%arg0: i32, %arg1: i32) -> (i32, i32) {
    %c0_i32 = arith.constant 0 : i32
    return %arg0, %arg1 : i32, i32
  }
}

</mosaic_0001>

<bundles_post_ra>
// kernel: tpu_custom_call.1
= control target key start
LH: loop header
LB: loop body
LE: loop exit
PB: predicated region body
PF: predicated region fallthrough
CT: control target
= control target key end

     0   :  { %s16_s0 = inlined_call_operand.hbm [shape: f32[2,1024], index: 0, kind: input, shape index: {}, may-alias: {0,1}]   ;;  %s17_s1 = inlined_call_operand.hbm [shape: f32[2,1024], index: 1, kind: output, shape index: {}, may-alias: {0,1}]  }

// kernel: tpu_custom_call.1
= control target key start
LH: loop header
LB: loop body
LE: loop exit
PB: predicated region body
PF: predicated region fallthrough
CT: control target
= control target key end

     0   :  { %6 = vsyncpa [#allocation3], 0  ;;  %s104_s0 = inlined_call_operand.hbm [shape: f32[1,2048], index: 0, kind: input, shape index: {}]   ;;  %s105_s1 = inlined_call_operand.hbm [shape: f32[1,2048], index: 1, kind: output, shape index: {}]  }
   0x1   :  { %7 = vsyncpa [#allocation4], 0  ;;  %s86_s6 = smov [#allocation2]  }
   0x2   :  { %s14_s7 = sshll.u32 %s86_s6, 4  ;;  %s15_s7 = int_to_ptr.vmem [resolvable:$true] %s14_s7 }
   0x3   :  { %s50_s8 = scalar_lea.vmem %s15_s7, 256  ;;  %p55_p1 = scmp.lt.s32.totalorder %s15_s7, %s15_s7 }
   0x4   :  { %p51_p0 = scmp.ne.s32.totalorder %s15_s7, %s50_s8  ;;  %p56_p2 = scmp.lt.s32.totalorder %s50_s8, %s50_s8 }
   0x6   :  { %p57_p3 = por %p56_p2, %p55_p1 }
   0x8   :  { %p58_p4 = pnand %p57_p3, %p51_p0 }
   0xa   :  { %61 = shalt.err (!%p58_p4)
}
   0xb   :  { %17 = dma.hbm_to_vmem [thread:$0]  %s104_s0, 256, %s15_s7, [#allocation3]  }
   0xc   :  { %82 = dma.done.wait [#allocation3], 256  }
   0xd   :  { %83 = vsyncadd [#allocation3], 4294967040  ;;  %s87_s11 = smov [#allocation5]   ;;  %v21_v0 = vld [vmem:[#allocation2] sm:$0xff]  ;;  %v22_v1 = vld [vmem:[#allocation2 + $0x8] sm:$0xff] }
   0xe   :  { %s31_s12 = sshll.u32 %s87_s11, 4  ;;  %23 = vst [vmem:[#allocation5] sm:$0xff] %v21_v0  ;;  %24 = vst [vmem:[#allocation5 + $0x8] sm:$0xff] %v22_v1  ;;  %s32_s12 = int_to_ptr.vmem [resolvable:$true] %s31_s12 }
   0xf   :  { %s62_s13 = scalar_lea.vmem %s32_s12, 256  ;;  %p67_p6 = scmp.lt.s32.totalorder %s32_s12, %s32_s12 }
  0x10   :  { %p63_p5 = scmp.ne.s32.totalorder %s32_s12, %s62_s13  ;;  %p68_p7 = scmp.lt.s32.totalorder %s62_s13, %s62_s13 }
  0x12   :  { %p69_p8 = por %p68_p7, %p67_p6 }
  0x14   :  { %p70_p9 = pnand %p69_p8, %p63_p5 }
  0x16   :  { %73 = shalt.err (!%p70_p9)
}
  0x17   :  { %34 = dma.vmem_to_hbm [thread:$0]  %s32_s12, 256, %s105_s1, [#allocation4]  }
  0x18   :  { %84 = dma.done.wait [#allocation4], 256  }
  0x19   :  { %85 = vsyncadd [#allocation4], 4294967040 }
  0x1a   :  { %38 = vsyncpa [#allocation3], 1 }
  0x1b   :  { %39 = vsyncpa [#allocation4], 1 }

</bundles_post_ra>
